<compile_context>
chip_gen: v7x
topology: tpu7x:2x2x1
jax: 0.10.0
libtpu: 0.0.40
codegen_flags: <defaults>
</compile_context>

<pallas_src>
import numpy as np
import jax
import jax.numpy as jnp
from jax.experimental import pallas as pl
from jax.experimental.pallas import tpu as pltpu

# ---- model hyper-parameters (small, deterministic) ----
B = 2            # batch
M = 32           # num_mels        (encoder feat_in)
T = 16           # time steps
H = 32           # hidden channels
F = 32           # final_filter    (decoder feat_in)
NC = 8           # num_classes
K = 3            # conv kernel size (time)
PAD = (K - 1) // 2
BT = B * T       # flattened batch*time rows (sublane axis)

C = 128          # lane-padded channel width for every layer
B_PAD = 8        # sublane-padded output rows
NC_PAD = 128     # lane-padded class dim

# ---- constant-slab row layout (all offsets multiples of 8) ----
WD_OFF = 3 * K * C            # 9 conv-tap blocks of 128 rows, then decoder W
NF_OFF = WD_OFF + C           # not_first mask, (BT, 128)
NL_OFF = NF_OFF + BT          # not_last mask,  (BT, 128)
POOL_OFF = NL_OFF + BT        # pool matrix,    (B_PAD, 128) (first BT lanes used)
B1_OFF = POOL_OFF + B_PAD     # biases: one 8-row block each, bias in row 0
B2_OFF = B1_OFF + 8
B3_OFF = B2_OFF + 8
BD_OFF = B3_OFF + 8
SLAB_ROWS = BD_OFF + 8        # 1384 rows x 128 lanes x f32  (~0.7 MB)


def encdec_kernel(len_ref,      # scalar prefetch: (B,) int32 in SMEM
                  x_ref,        # (BT, C)   lane-padded mel features
                  slab_ref,     # (SLAB_ROWS, C) packed weights + constants
                  out_ref):     # (B_PAD, NC_PAD) logits (padded)
    # ---- length-dependent validity mask (only runtime-dependent mask) ----
    row = jax.lax.broadcasted_iota(jnp.int32, (BT, C), 0)
    valid = jnp.zeros((BT, C), jnp.float32)
    for b in range(B):                       # B is tiny -> static unroll
        length = len_ref[b]
        valid = valid + ((row >= b * T) & (row < b * T + length)).astype(jnp.float32)

    # ---- runtime-invariant masks, baked into the constant slab at init ----
    not_first = slab_ref[NF_OFF:NF_OFF + BT, :]   # zero at each sample's t==0
    not_last = slab_ref[NL_OFF:NL_OFF + BT, :]    # zero at each sample's t==T-1

    def conv_relu(h, layer, bias_off):
        base = layer * K * C
        w_prev = slab_ref[base:base + C, :]
        w_mid = slab_ref[base + C:base + 2 * C, :]
        w_next = slab_ref[base + 2 * C:base + 3 * C, :]
        bias = slab_ref[bias_off:bias_off + 1, :]
        # time-shifted taps: single XLU sublane rotate + one-row boundary masks
        h_prev = pltpu.roll(h, 1, axis=0) * not_first
        h_next = pltpu.roll(h, BT - 1, axis=0) * not_last   # == shift by -1
        # three accumulating MXU dots (no lane-concat im2col)
        y = jnp.dot(h, w_mid, preferred_element_type=jnp.float32)
        y = y + jnp.dot(h_prev, w_prev, preferred_element_type=jnp.float32)
        y = y + jnp.dot(h_next, w_next, preferred_element_type=jnp.float32)
        return jnp.maximum(y + bias, 0.0) * valid   # == input mask of next layer

    h = x_ref[...] * valid                  # MaskedConv1d input masking
    h = conv_relu(h, 0, B1_OFF)
    h = conv_relu(h, 1, B2_OFF)
    h = conv_relu(h, 2, B3_OFF)

    # ---- decoder: avg pool over time (sum / T via constant pool matmul) + linear
    pool = slab_ref[POOL_OFF:POOL_OFF + B_PAD, 0:BT]                 # (8, BT)
    pooled = jnp.dot(pool, h, preferred_element_type=jnp.float32)    # (8, C)
    wd = slab_ref[WD_OFF:WD_OFF + C, :]
    bd = slab_ref[BD_OFF:BD_OFF + 1, :]
    out_ref[...] = jnp.dot(pooled, wd, preferred_element_type=jnp.float32) + bd


def pack_slab(params):
    """One-time (init) packing of all weights, biases and constant masks into a
    single 128-lane slab. Keeps the jit hot path free of packing ops."""
    w1, b1, w2, b2, w3, b3, wd, bd = params
    slab = np.zeros((SLAB_ROWS, C), np.float32)

    convs = [(np.asarray(w1), M, H), (np.asarray(w2), H, H), (np.asarray(w3), H, F)]
    for layer, (w, cin, cout) in enumerate(convs):
        for k in range(K):
            r0 = (layer * K + k) * C
            slab[r0:r0 + cin, :cout] = w[k]

    slab[WD_OFF:WD_OFF + F, :NC] = np.asarray(wd)

    t = np.arange(BT)
    nf = (t % T != 0).astype(np.float32)[:, None]         # zero at sample starts
    nl = (t % T != T - 1).astype(np.float32)[:, None]     # zero at sample ends
    slab[NF_OFF:NF_OFF + BT, :] = np.broadcast_to(nf, (BT, C))
    slab[NL_OFF:NL_OFF + BT, :] = np.broadcast_to(nl, (BT, C))

    pool = np.zeros((B_PAD, C), np.float32)
    for b in range(B):
        pool[b, b * T:(b + 1) * T] = 1.0 / T               # sum / T (matches ref)
    slab[POOL_OFF:POOL_OFF + B_PAD, :] = pool

    slab[B1_OFF, :H] = np.asarray(b1).reshape(-1)
    slab[B2_OFF, :H] = np.asarray(b2).reshape(-1)
    slab[B3_OFF, :F] = np.asarray(b3).reshape(-1)
    slab[BD_OFF, :NC] = np.asarray(bd).reshape(-1)
    return jnp.asarray(slab)


@jax.jit
def encdec_forward(input_signal, input_signal_length, slab):
    """input_signal: (B, num_mels, T) float32 (PyTorch NCT); lengths: (B,) int32."""
    x = jnp.transpose(input_signal, (0, 2, 1)).astype(jnp.float32).reshape(BT, M)
    x = jnp.pad(x, ((0, 0), (0, C - M)))                   # lane-pad channels to 128
    lengths = input_signal_length.astype(jnp.int32)

    full = lambda shape: pl.BlockSpec(shape, lambda i, lens: (0,) * len(shape))
    grid_spec = pltpu.PrefetchScalarGridSpec(
        num_scalar_prefetch=1,
        grid=(1,),                                          # whole batch at once
        in_specs=[full((BT, C)), full((SLAB_ROWS, C))],
        out_specs=full((B_PAD, NC_PAD)),
    )

    flops = 2 * BT * C * C * (K * 3) + 2 * B_PAD * BT * C + 2 * B_PAD * C * NC_PAD
    bytes_accessed = 4 * (B + BT * C + SLAB_ROWS * C + B_PAD * NC_PAD)
    cost = pl.CostEstimate(flops=flops, transcendentals=0,
                           bytes_accessed=bytes_accessed)

    out = pl.pallas_call(
        encdec_kernel,
        out_shape=jax.ShapeDtypeStruct((B_PAD, NC_PAD), jnp.float32),
        grid_spec=grid_spec,
        compiler_params=pltpu.CompilerParams(dimension_semantics=("arbitrary",)),
        cost_estimate=cost,
    )(lengths, x, slab)
    return out[:B, :NC]


def ref_forward(input_signal, input_signal_length, params):
    """Pure-JAX reference for correctness checking."""
    w1, b1, w2, b2, w3, b3, wd, bd = params
    x = jnp.transpose(input_signal, (0, 2, 1)).astype(jnp.float32)       # (B, T, M)
    t = jnp.arange(T)[None, :, None]
    valid = (t < input_signal_length[:, None, None]).astype(jnp.float32)

    def conv(xin, w, bb):
        xp = jnp.pad(xin, ((0, 0), (PAD, PAD), (0, 0)))
        acc = sum(jnp.einsum('btc,cd->btd', xp[:, k:k + T, :], w[k]) for k in range(K))
        return jnp.maximum(acc + bb, 0.0) * valid

    h = conv(x * valid, w1, b1)
    h = conv(h, w2, b2)
    h = conv(h, w3, b3)
    pooled = jnp.mean(h, axis=1)                                         # (B, F)
    return pooled @ wd + bd[0]


def init_params(key):
    ks = jax.random.split(key, 4)
    scale = 0.1
    w1 = scale * jax.random.normal(ks[0], (K, M, H), jnp.float32)
    b1 = jnp.zeros((1, H), jnp.float32)
    w2 = scale * jax.random.normal(ks[1], (K, H, H), jnp.float32)
    b2 = jnp.zeros((1, H), jnp.float32)
    w3 = scale * jax.random.normal(ks[2], (K, H, F), jnp.float32)
    b3 = jnp.zeros((1, F), jnp.float32)
    wd = scale * jax.random.normal(ks[3], (F, NC), jnp.float32)
    bd = jnp.zeros((1, NC), jnp.float32)
    return (w1, b1, w2, b2, w3, b3, wd, bd)


if __name__ == "__main__":
    key = jax.random.PRNGKey(0)
    k_x, k_p = jax.random.split(key)

    input_signal = jax.random.normal(k_x, (B, M, T), jnp.float32)   # (B, num_mels, T)
    input_signal_length = jnp.array([T, T - 4], dtype=jnp.int32)    # ragged lengths
    params = init_params(k_p)

    slab = pack_slab(params)                                        # init-time packing

    logits = encdec_forward(input_signal, input_signal_length, slab)
    logits = jax.block_until_ready(logits)

    ref = ref_forward(input_signal, input_signal_length, params)
    assert logits.shape == (B, NC)
    assert jnp.allclose(logits, ref, atol=1e-4, rtol=1e-4), (logits, ref)

    print("KERNEL_OK")
</pallas_src>

<mosaic_0001>
module attributes {stable_mosaic.version = 11 : i64} {
  func.func @encdec_kernel(%arg0: i32, %arg1: memref<2xi32, #tpu.memory_space<smem>>, %arg2: memref<32x128xf32, #tpu.memory_space<vmem>>, %arg3: memref<1384x128xf32, #tpu.memory_space<vmem>>, %arg4: memref<8x128xf32, #tpu.memory_space<vmem>>) attributes {dimension_semantics = [#tpu.dimension_semantics<arbitrary>], iteration_bounds = array<i64: 1>, scalar_prefetch = 1 : i64, scratch_operands = 0 : i64, tpu.core_type = #tpu.core_type<tc>, window_params = [{pipeline_mode = #tpu.pipeline_mode<synchronous>, transform_indices = @transform_0, window_bounds = array<i64: 32, 128>}, {pipeline_mode = #tpu.pipeline_mode<synchronous>, transform_indices = @transform_1, window_bounds = array<i64: 1384, 128>}, {pipeline_mode = #tpu.pipeline_mode<synchronous>, transform_indices = @transform_2, window_bounds = array<i64: 8, 128>}]} {
    %0 = tpu.iota {dimensions = array<i32: 0>} : vector<32x128xi32>
    %cst = arith.constant 0.000000e+00 : f32
    %1 = vector.broadcast %cst : f32 to vector<32x128xf32>
    %c0 = arith.constant 0 : index
    %2 = memref.load %arg1[%c0] : memref<2xi32, #tpu.memory_space<smem>>
    %c0_i32 = arith.constant 0 : i32
    %3 = vector.broadcast %c0_i32 : i32 to vector<32x128xi32>
    %4 = arith.cmpi sge, %0, %3 : vector<32x128xi32>
    %c0_i32_0 = arith.constant 0 : i32
    %5 = arith.addi %c0_i32_0, %2 : i32
    %6 = vector.broadcast %5 : i32 to vector<32x128xi32>
    %7 = arith.cmpi slt, %0, %6 : vector<32x128xi32>
    %8 = arith.andi %4, %7 : vector<32x128xi1>
    %9 = arith.extui %8 : vector<32x128xi1> to vector<32x128xi32>
    %10 = arith.sitofp %9 : vector<32x128xi32> to vector<32x128xf32>
    %11 = arith.addf %1, %10 : vector<32x128xf32>
    %c1 = arith.constant 1 : index
    %12 = memref.load %arg1[%c1] : memref<2xi32, #tpu.memory_space<smem>>
    %c16_i32 = arith.constant 16 : i32
    %13 = vector.broadcast %c16_i32 : i32 to vector<32x128xi32>
    %14 = arith.cmpi sge, %0, %13 : vector<32x128xi32>
    %c16_i32_1 = arith.constant 16 : i32
    %15 = arith.addi %c16_i32_1, %12 : i32
    %16 = vector.broadcast %15 : i32 to vector<32x128xi32>
    %17 = arith.cmpi slt, %0, %16 : vector<32x128xi32>
    %18 = arith.andi %14, %17 : vector<32x128xi1>
    %19 = arith.extui %18 : vector<32x128xi1> to vector<32x128xi32>
    %20 = arith.sitofp %19 : vector<32x128xi32> to vector<32x128xf32>
    %21 = arith.addf %11, %20 : vector<32x128xf32>
    %c1280 = arith.constant 1280 : index
    %c0_2 = arith.constant 0 : index
    %22 = vector.load %arg3[%c1280, %c0_2] : memref<1384x128xf32, #tpu.memory_space<vmem>>, vector<32x128xf32>
    %c1312 = arith.constant 1312 : index
    %c0_3 = arith.constant 0 : index
    %23 = vector.load %arg3[%c1312, %c0_3] : memref<1384x128xf32, #tpu.memory_space<vmem>>, vector<32x128xf32>
    %c0_4 = arith.constant 0 : index
    %c0_5 = arith.constant 0 : index
    %24 = vector.load %arg2[%c0_4, %c0_5] : memref<32x128xf32, #tpu.memory_space<vmem>>, vector<32x128xf32>
    %25 = arith.mulf %24, %21 : vector<32x128xf32>
    %c0_6 = arith.constant 0 : index
    %c0_7 = arith.constant 0 : index
    %26 = vector.load %arg3[%c0_6, %c0_7] : memref<1384x128xf32, #tpu.memory_space<vmem>>, vector<128x128xf32>
    %c128 = arith.constant 128 : index
    %c0_8 = arith.constant 0 : index
    %27 = vector.load %arg3[%c128, %c0_8] : memref<1384x128xf32, #tpu.memory_space<vmem>>, vector<128x128xf32>
    %c256 = arith.constant 256 : index
    %c0_9 = arith.constant 0 : index
    %28 = vector.load %arg3[%c256, %c0_9] : memref<1384x128xf32, #tpu.memory_space<vmem>>, vector<128x128xf32>
    %c1352 = arith.constant 1352 : index
    %c0_10 = arith.constant 0 : index
    %29 = vector.load %arg3[%c1352, %c0_10] : memref<1384x128xf32, #tpu.memory_space<vmem>>, vector<1x128xf32>
    %c1_i32 = arith.constant 1 : i32
    %30 = tpu.dynamic_rotate %25 by %c1_i32 dim 0 : vector<32x128xf32>, i32 -> vector<32x128xf32>
    %31 = arith.mulf %30, %22 : vector<32x128xf32>
    %c31_i32 = arith.constant 31 : i32
    %32 = tpu.dynamic_rotate %25 by %c31_i32 dim 0 : vector<32x128xf32>, i32 -> vector<32x128xf32>
    %33 = arith.mulf %32, %23 : vector<32x128xf32>
    %cst_11 = arith.constant dense<0.000000e+00> : vector<32x128xf32>
    %34 = tpu.matmul %25, %27, %cst_11 {dimension_numbers = #tpu.dot_dimension_numbers<[1], [0], [0], [1], [0, 0, 1, 1], [], []>} : vector<32x128xf32>, vector<128x128xf32>, vector<32x128xf32> -> vector<32x128xf32>
    %cst_12 = arith.constant dense<0.000000e+00> : vector<32x128xf32>
    %35 = tpu.matmul %31, %26, %cst_12 {dimension_numbers = #tpu.dot_dimension_numbers<[1], [0], [0], [1], [0, 0, 1, 1], [], []>} : vector<32x128xf32>, vector<128x128xf32>, vector<32x128xf32> -> vector<32x128xf32>
    %36 = arith.addf %34, %35 : vector<32x128xf32>
    %cst_13 = arith.constant dense<0.000000e+00> : vector<32x128xf32>
    %37 = tpu.matmul %33, %28, %cst_13 {dimension_numbers = #tpu.dot_dimension_numbers<[1], [0], [0], [1], [0, 0, 1, 1], [], []>} : vector<32x128xf32>, vector<128x128xf32>, vector<32x128xf32> -> vector<32x128xf32>
    %38 = arith.addf %36, %37 : vector<32x128xf32>
    %39 = vector.broadcast %29 : vector<1x128xf32> to vector<32x128xf32>
    %40 = arith.addf %38, %39 : vector<32x128xf32>
    %cst_14 = arith.constant 0.000000e+00 : f32
    %41 = vector.broadcast %cst_14 : f32 to vector<32x128xf32>
    %42 = arith.maximumf %40, %41 : vector<32x128xf32>
    %43 = arith.mulf %42, %21 : vector<32x128xf32>
    %c384 = arith.constant 384 : index
    %c0_15 = arith.constant 0 : index
    %44 = vector.load %arg3[%c384, %c0_15] : memref<1384x128xf32, #tpu.memory_space<vmem>>, vector<128x128xf32>
    %c512 = arith.constant 512 : index
    %c0_16 = arith.constant 0 : index
    %45 = vector.load %arg3[%c512, %c0_16] : memref<1384x128xf32, #tpu.memory_space<vmem>>, vector<128x128xf32>
    %c640 = arith.constant 640 : index
    %c0_17 = arith.constant 0 : index
    %46 = vector.load %arg3[%c640, %c0_17] : memref<1384x128xf32, #tpu.memory_space<vmem>>, vector<128x128xf32>
    %c1360 = arith.constant 1360 : index
    %c0_18 = arith.constant 0 : index
    %47 = vector.load %arg3[%c1360, %c0_18] : memref<1384x128xf32, #tpu.memory_space<vmem>>, vector<1x128xf32>
    %c1_i32_19 = arith.constant 1 : i32
    %48 = tpu.dynamic_rotate %43 by %c1_i32_19 dim 0 : vector<32x128xf32>, i32 -> vector<32x128xf32>
    %49 = arith.mulf %48, %22 : vector<32x128xf32>
    %c31_i32_20 = arith.constant 31 : i32
    %50 = tpu.dynamic_rotate %43 by %c31_i32_20 dim 0 : vector<32x128xf32>, i32 -> vector<32x128xf32>
    %51 = arith.mulf %50, %23 : vector<32x128xf32>
    %cst_21 = arith.constant dense<0.000000e+00> : vector<32x128xf32>
    %52 = tpu.matmul %43, %45, %cst_21 {dimension_numbers = #tpu.dot_dimension_numbers<[1], [0], [0], [1], [0, 0, 1, 1], [], []>} : vector<32x128xf32>, vector<128x128xf32>, vector<32x128xf32> -> vector<32x128xf32>
    %cst_22 = arith.constant dense<0.000000e+00> : vector<32x128xf32>
    %53 = tpu.matmul %49, %44, %cst_22 {dimension_numbers = #tpu.dot_dimension_numbers<[1], [0], [0], [1], [0, 0, 1, 1], [], []>} : vector<32x128xf32>, vector<128x128xf32>, vector<32x128xf32> -> vector<32x128xf32>
    %54 = arith.addf %52, %53 : vector<32x128xf32>
    %cst_23 = arith.constant dense<0.000000e+00> : vector<32x128xf32>
    %55 = tpu.matmul %51, %46, %cst_23 {dimension_numbers = #tpu.dot_dimension_numbers<[1], [0], [0], [1], [0, 0, 1, 1], [], []>} : vector<32x128xf32>, vector<128x128xf32>, vector<32x128xf32> -> vector<32x128xf32>
    %56 = arith.addf %54, %55 : vector<32x128xf32>
    %57 = vector.broadcast %47 : vector<1x128xf32> to vector<32x128xf32>
    %58 = arith.addf %56, %57 : vector<32x128xf32>
    %cst_24 = arith.constant 0.000000e+00 : f32
    %59 = vector.broadcast %cst_24 : f32 to vector<32x128xf32>
    %60 = arith.maximumf %58, %59 : vector<32x128xf32>
    %61 = arith.mulf %60, %21 : vector<32x128xf32>
    %c768 = arith.constant 768 : index
    %c0_25 = arith.constant 0 : index
    %62 = vector.load %arg3[%c768, %c0_25] : memref<1384x128xf32, #tpu.memory_space<vmem>>, vector<128x128xf32>
    %c896 = arith.constant 896 : index
    %c0_26 = arith.constant 0 : index
    %63 = vector.load %arg3[%c896, %c0_26] : memref<1384x128xf32, #tpu.memory_space<vmem>>, vector<128x128xf32>
    %c1024 = arith.constant 1024 : index
    %c0_27 = arith.constant 0 : index
    %64 = vector.load %arg3[%c1024, %c0_27] : memref<1384x128xf32, #tpu.memory_space<vmem>>, vector<128x128xf32>
    %c1368 = arith.constant 1368 : index
    %c0_28 = arith.constant 0 : index
    %65 = vector.load %arg3[%c1368, %c0_28] : memref<1384x128xf32, #tpu.memory_space<vmem>>, vector<1x128xf32>
    %c1_i32_29 = arith.constant 1 : i32
    %66 = tpu.dynamic_rotate %61 by %c1_i32_29 dim 0 : vector<32x128xf32>, i32 -> vector<32x128xf32>
    %67 = arith.mulf %66, %22 : vector<32x128xf32>
    %c31_i32_30 = arith.constant 31 : i32
    %68 = tpu.dynamic_rotate %61 by %c31_i32_30 dim 0 : vector<32x128xf32>, i32 -> vector<32x128xf32>
    %69 = arith.mulf %68, %23 : vector<32x128xf32>
    %cst_31 = arith.constant dense<0.000000e+00> : vector<32x128xf32>
    %70 = tpu.matmul %61, %63, %cst_31 {dimension_numbers = #tpu.dot_dimension_numbers<[1], [0], [0], [1], [0, 0, 1, 1], [], []>} : vector<32x128xf32>, vector<128x128xf32>, vector<32x128xf32> -> vector<32x128xf32>
    %cst_32 = arith.constant dense<0.000000e+00> : vector<32x128xf32>
    %71 = tpu.matmul %67, %62, %cst_32 {dimension_numbers = #tpu.dot_dimension_numbers<[1], [0], [0], [1], [0, 0, 1, 1], [], []>} : vector<32x128xf32>, vector<128x128xf32>, vector<32x128xf32> -> vector<32x128xf32>
    %72 = arith.addf %70, %71 : vector<32x128xf32>
    %cst_33 = arith.constant dense<0.000000e+00> : vector<32x128xf32>
    %73 = tpu.matmul %69, %64, %cst_33 {dimension_numbers = #tpu.dot_dimension_numbers<[1], [0], [0], [1], [0, 0, 1, 1], [], []>} : vector<32x128xf32>, vector<128x128xf32>, vector<32x128xf32> -> vector<32x128xf32>
    %74 = arith.addf %72, %73 : vector<32x128xf32>
    %75 = vector.broadcast %65 : vector<1x128xf32> to vector<32x128xf32>
    %76 = arith.addf %74, %75 : vector<32x128xf32>
    %cst_34 = arith.constant 0.000000e+00 : f32
    %77 = vector.broadcast %cst_34 : f32 to vector<32x128xf32>
    %78 = arith.maximumf %76, %77 : vector<32x128xf32>
    %79 = arith.mulf %78, %21 : vector<32x128xf32>
    %c1344 = arith.constant 1344 : index
    %c0_35 = arith.constant 0 : index
    %80 = vector.load %arg3[%c1344, %c0_35] : memref<1384x128xf32, #tpu.memory_space<vmem>>, vector<8x32xf32>
    %cst_36 = arith.constant dense<0.000000e+00> : vector<8x128xf32>
    %81 = tpu.matmul %80, %79, %cst_36 {dimension_numbers = #tpu.dot_dimension_numbers<[1], [0], [0], [1], [0, 0, 1, 1], [], []>} : vector<8x32xf32>, vector<32x128xf32>, vector<8x128xf32> -> vector<8x128xf32>
    %c1152 = arith.constant 1152 : index
    %c0_37 = arith.constant 0 : index
    %82 = vector.load %arg3[%c1152, %c0_37] : memref<1384x128xf32, #tpu.memory_space<vmem>>, vector<128x128xf32>
    %c1376 = arith.constant 1376 : index
    %c0_38 = arith.constant 0 : index
    %83 = vector.load %arg3[%c1376, %c0_38] : memref<1384x128xf32, #tpu.memory_space<vmem>>, vector<1x128xf32>
    %cst_39 = arith.constant dense<0.000000e+00> : vector<8x128xf32>
    %84 = tpu.matmul %81, %82, %cst_39 {dimension_numbers = #tpu.dot_dimension_numbers<[1], [0], [0], [1], [0, 0, 1, 1], [], []>} : vector<8x128xf32>, vector<128x128xf32>, vector<8x128xf32> -> vector<8x128xf32>
    %85 = vector.broadcast %83 : vector<1x128xf32> to vector<8x128xf32>
    %86 = arith.addf %84, %85 : vector<8x128xf32>
    %c0_40 = arith.constant 0 : index
    %c0_41 = arith.constant 0 : index
    %87 = vector.load %arg4[%c0_40, %c0_41] : memref<8x128xf32, #tpu.memory_space<vmem>>, vector<8x128xf32>
    tpu.vector_store %arg4[%c0_40, %c0_41], %86 {strides = array<i32>} : memref<8x128xf32, #tpu.memory_space<vmem>>, vector<8x128xf32>,
    return
  }
  func.func @transform_0(%arg0: i32, %arg1: memref<2xi32, #tpu.memory_space<smem>>) -> (i32, i32) {
    %c0_i32 = arith.constant 0 : i32
    %c0_i32_0 = arith.constant 0 : i32
    %c0_i32_1 = arith.constant 0 : i32
    return %c0_i32, %c0_i32_0 : i32, i32
  }
  func.func @transform_1(%arg0: i32, %arg1: memref<2xi32, #tpu.memory_space<smem>>) -> (i32, i32) {
    %c0_i32 = arith.constant 0 : i32
    %c0_i32_0 = arith.constant 0 : i32
    %c0_i32_1 = arith.constant 0 : i32
    return %c0_i32, %c0_i32_0 : i32, i32
  }
  func.func @transform_2(%arg0: i32, %arg1: memref<2xi32, #tpu.memory_space<smem>>) -> (i32, i32) {
    %c0_i32 = arith.constant 0 : i32
    %c0_i32_0 = arith.constant 0 : i32
    %c0_i32_1 = arith.constant 0 : i32
    return %c0_i32, %c0_i32_0 : i32, i32
  }
}

</mosaic_0001>

<bundles_post_ra>
// kernel: encdec_forward.1
= control target key start
LH: loop header
LB: loop body
LE: loop exit
PB: predicated region body
PF: predicated region fallthrough
CT: control target
= control target key end

     0   :  { %s2614_s0 = inlined_call_operand.vmem [shape: s32[2], index: 0, kind: input, shape index: {}]   ;;  %s2615_s1 = inlined_call_operand.vmem [shape: f32[32,128], index: 1, kind: input, shape index: {}]   ;;  %s2616_s2 = inlined_call_operand.hbm [shape: f32[1384,128], index: 2, kind: input, shape index: {}]   ;;  %s2617_s3 = inlined_call_operand.vmem [shape: f32[8,128], index: 3, kind: output, shape index: {}]  }
   0x1   :  { %s8_s14 = sshll.u32 %s2614_s0, 4  ;;  %s9_s14 = int_to_ptr.vmem [resolvable:$true] %s8_s14 }
   0x2   :  { %s2275_s15 = scalar_lea.vmem %s9_s14, 16  ;;  %p2280_p1 = scmp.lt.s32.totalorder %s9_s14, %s9_s14 }
   0x3   :  { %p2276_p0 = scmp.ne.s32.totalorder %s9_s14, %s2275_s15  ;;  %p2281_p2 = scmp.lt.s32.totalorder %s2275_s15, %s2275_s15 }
   0x5   :  { %p2282_p3 = por %p2281_p2, %p2280_p1 }
   0x7   :  { %p2283_p4 = pnand %p2282_p3, %p2276_p0 }
   0x9   :  { %2286 = shalt.err (!%p2283_p4)  }
   0xa   :  { %s2313_s16 = smov [#allocation3]  }
   0xb   :  { %11 = dma.vmem_to_smem %s9_s14, 16, %s2313_s16, [#allocation2] }
   0xc   :  { %2309 = dma.done.wait [#allocation2], 16 }
   0xd   :  { %2310 = vsyncadd [#allocation2], 4294967280 }
   0xe   :  { %13 = sfence }
   0xf   :  { %14 = vsyncpa [#allocation5], 0  ;;  %s2314_s17 = smov [#allocation4]   ;;  %s2287_s0 = scalar_lea.hbm %s2616_s2, 22144 }
  0x10   :  { %s22_s18 = sshll.u32 %s2314_s17, 4  ;;  %p2288_p5 = scmp.ne.s32.totalorder %s2616_s2, %s2287_s0  ;;  %s23_s18 = int_to_ptr.vmem [resolvable:$true] %s22_s18 }
  0x11   :  { %p2291_p6 = scmp.lt.u32.totalorder %s2287_s0, %s2616_s2 }
  0x13   :  { %p2293_p7 = pnand %p2291_p6, %p2288_p5 }
  0x15   :  { %2296 = shalt.err (!%p2293_p7)
}
  0x16   :  { %s2297_s25 = scalar_lea.vmem %s23_s18, 22144  ;;  %p2302_p9 = scmp.lt.s32.totalorder %s23_s18, %s23_s18 }
  0x17   :  { %p2298_p8 = scmp.ne.s32.totalorder %s23_s18, %s2297_s25  ;;  %p2303_p10 = scmp.lt.s32.totalorder %s2297_s25, %s2297_s25 }
  0x19   :  { %p2304_p11 = por %p2303_p10, %p2302_p9 }
  0x1b   :  { %p2305_p12 = pnand %p2304_p11, %p2298_p8 }
  0x1d   :  { %2308 = shalt.err (!%p2305_p12)
}
  0x1e   :  { %s2315_s26 = smov 128   ;;  %s2316_s27 = smov 8  }
  0x1f   :  { %28 = dma.hbm_to_vmem [thread:$0]  %s2616_s2, 22144, %s23_s18, [#allocation5], %s2315_s26, %s2315_s26, %s2316_s27  }
  0x20   :  { %2311 = dma.done.wait [#allocation5], 22144  }
  0x21   :  { %2312 = vsyncadd [#allocation5], 4294945152  ;;  %v32_v0 = vlaneseq  ;;  %s37_s30 = sld [smem:[#allocation3]]  ;;  %s1328_s4 = sld [smem:[#allocation3 + $0x1]]  ;;  %v122_v2 = vld [vmem:[#allocation4 + $0x80] sm:$0xff]  ;;  %v123_v3 = vld [vmem:[#allocation4 + $0x88] sm:$0xff] }
  0x22   :  { %v124_v4 = vld [vmem:[#allocation4 + $0x90] sm:$0xff]  ;;  %v1958_v6 = vpack.c.bf16 %v123_v3, %v122_v2  ;;  %v125_v7 = vld [vmem:[#allocation4 + $0x98] sm:$0xff]  ;;  %v126_v9 = vld [vmem:[#allocation4 + $0xa0] sm:$0xff]  ;;  %v2317_v12 = vmov 0.0   ;;  %vm2319_vm8 = vmmov 0   ;;  %vm1153_vm9 = vcmask 261120  }
  0x23   :  { %v2355_v1 = vshrl.u32 %v32_v0, 7  ;;  %v1962_v8 = vpack.c.bf16 %v125_v7, %v124_v4  ;;  %v127_v10 = vld [vmem:[#allocation4 + $0xa8] sm:$0xff]  ;;  %v106_v16 = vld [vmem:[#allocation4] sm:$0xff]  ;;  %v128_v18 = vld [vmem:[#allocation4 + $0xb0] sm:$0xff] }
  0x24   :  { %1959 = vmatprep.subr.bf16.mxu0 %v1958_v6  ;;  %v1966_v15 = vpack.c.bf16 %v127_v10, %v126_v9  ;;  %v107_v17 = vld [vmem:[#allocation4 + $0x8] sm:$0xff]  ;;  %v129_v19 = vld [vmem:[#allocation4 + $0xb8] sm:$0xff]  ;;  %v98_v21 = vld [vmem:[%s2615_s1] sm:$0xff] }
  0x25   :  { %v36_v11 = vadd.s32 24, %v2355_v1  ;;  %1961 = vmatpush3.bf16.msra.mxu0 %v1958_v6  ;;  %v1926_v20 = vpack.c.bf16 %v107_v17, %v106_v16  ;;  %v108_v23 = vld [vmem:[#allocation4 + $0x10] sm:$0xff]  ;;  %v109_v24 = vld [vmem:[#allocation4 + $0x18] sm:$0xff]  ;;  %v110_v26 = vld [vmem:[#allocation4 + $0x20] sm:$0xff]  ;;  %v1970_v27 = vpack.c.bf16 %v129_v19, %v128_v18  ;;  %v35_v43 = vadd.s32 16, %v2355_v1 }
  0x26   :  { %1963 = vmatprep.subr.bf16.mxu0 %v1962_v8  ;;  %v1930_v25 = vpack.c.bf16 %v109_v24, %v108_v23  ;;  %v111_v28 = vld [vmem:[#allocation4 + $0x28] sm:$0xff]  ;;  %v130_v29 = vld [vmem:[#allocation4 + $0xc0] sm:$0xff]  ;;  %v112_v34 = vld [vmem:[#allocation4 + $0x30] sm:$0xff]  ;;  %v34_v46 = vadd.s32 8, %v2355_v1  ;;  %vm159_vm3 = vcmp.lt.s32.totalorder %v2355_v1, 1  ;;  %vm172_vm7 = vcmp.lt.s32.totalorder %v2355_v1, 7 }
  0x27   :  { %v2357_v5 = vstv %s37_s30  ;;  %s68_s5 = sadd.s32 16, %s1328_s4  ;;  %1927 = vmatprep.subr.bf16.mxu1 %v1926_v20  ;;  %v131_v30 = vld [vmem:[#allocation4 + $0xc8] sm:$0xff]  ;;  %v1934_v31 = vpack.c.bf16 %v111_v28, %v110_v26  ;;  %v113_v35 = vld [vmem:[#allocation4 + $0x38] sm:$0xff]  ;;  %v132_v38 = vld [vmem:[#allocation4 + $0xd0] sm:$0xff] }
  0x28   :  { %vm43_vm0 = vcmp.lt.s32.totalorder %v2355_v1, %v2357_v5  ;;  %v2365_v14 = vstv %s68_s5  ;;  %vm46_vm1 = vcmp.lt.s32.totalorder %v36_v11, %v2357_v5  ;;  %1929 = vmatpush3.bf16.msra.mxu1 %v1926_v20  ;;  %v1974_v36 = vpack.c.bf16 %v131_v30, %v130_v29  ;;  %v133_v39 = vld [vmem:[#allocation4 + $0xd8] sm:$0xff]  ;;  %v114_v41 = vld [vmem:[#allocation4 + $0x40] sm:$0xff]  ;;  %v115_v42 = vld [vmem:[#allocation4 + $0x48] sm:$0xff] }
  0x29   :  { %v2363_v13 = vsel %vm43_vm0, 1.0, %v2317_v12  ;;  %vm73_vm2 = vcmp.lt.s32.totalorder %v36_v11, %v2365_v14  ;;  %1965 = vmatpush3.bf16.msra.mxu0 %v1962_v8  ;;  %1931 = vmatprep.subr.bf16.mxu1 %v1930_v25  ;;  %v1327_v32 = vsel %vm46_vm1, 1.0, %v2317_v12  ;;  %v1938_v40 = vpack.c.bf16 %v113_v35, %v112_v34  ;;  %v101_v44 = vld [vmem:[%s2615_s1 + $0x18] sm:$0xff]  ;;  %v134_v49 = vld [vmem:[#allocation4 + $0xe0] sm:$0xff]  ;;  %v135_v50 = vld [vmem:[#allocation4 + $0xe8] sm:$0xff] }
  0x2a   :  { %v2371_v22 = vmul.f32 %v2363_v13, %v98_v21  ;;  %1967 = vmatprep.subr.bf16.mxu0 %v1966_v15  ;;  %v1330_v33 = vsel %vm73_vm2, 1.0, %v2317_v12  ;;  %v1978_v45 = vpack.c.bf16 %v133_v39, %v132_v38  ;;  %v1942_v51 = vpack.c.bf16 %v115_v42, %v114_v41  ;;  %v116_v52 = vld [vmem:[#allocation4 + $0x50] sm:$0xff]  ;;  %v117_v53 = vld [vmem:[#allocation4 + $0x58] sm:$0xff]  ;;  %v2392_v54 = vld [vmem:[#allocation4 + $0x500] sm:$0xff] }
  0x2b   :  { %v2378_v37 = vadd.f32 %v1330_v33, %v1327_v32  ;;  %vm45_vm4 = vcmp.lt.s32.totalorder %v35_v43, %v2357_v5  ;;  %vm72_vm5 = vcmp.lt.s32.totalorder %v35_v43, %v2365_v14  ;;  %v1982_v56 = vpack.c.bf16 %v135_v50, %v134_v49  ;;  %v136_v58 = vld [vmem:[#allocation4 + $0xf0] sm:$0xff]  ;;  %v137_v59 = vld [vmem:[#allocation4 + $0xf8] sm:$0xff]  ;;  %v118_v0 = vld [vmem:[#allocation4 + $0x60] sm:$0xff] }
  0x2c   :  { %1608 = vmatprep.mubr.f32.mxu0 %v2371_v22  ;;  %1933 = vmatpush3.bf16.msra.mxu1 %v1930_v25  ;;  %v155_v48 = vrot.slane %v2371_v22, 7  ;;  %vm44_vm6 = vcmp.lt.s32.totalorder %v34_v46, %v2357_v5  ;;  %v1946_v60 = vpack.c.bf16 %v117_v53, %v116_v52  ;;  %v1326_v61 = vsel %vm45_vm4, 1.0, %v2317_v12  ;;  %v119_v2 = vld [vmem:[#allocation4 + $0x68] sm:$0xff]  ;;  %v138_v7 = vld [vmem:[#allocation4 + $0x100] sm:$0xff]  ;;  %v100_v10 = vld [vmem:[%s2615_s1 + $0x10] sm:$0xff] }
  0x2d   :  { %1969 = vmatpush3.bf16.msra.mxu0 %v1966_v15  ;;  %1935 = vmatprep.subr.bf16.mxu1 %v1934_v31  ;;  %v2386_v47 = vmul.f32 %v101_v44, %v2378_v37  ;;  %v1329_v62 = vsel %vm72_vm5, 1.0, %v2317_v12  ;;  %v2406_v3 = vsel %vm44_vm6, 1.0, %v2317_v12  ;;  %v99_v4 = vld [vmem:[%s2615_s1 + $0x8] sm:$0xff]  ;;  %v1986_v5 = vpack.c.bf16 %v137_v59, %v136_v58  ;;  %v120_v14 = vld [vmem:[#allocation4 + $0x70] sm:$0xff]  ;;  %v121_v15 = vld [vmem:[#allocation4 + $0x78] sm:$0xff] }
  0x2e   :  { %1971 = vmatprep.subr.bf16.mxu0 %v1970_v27  ;;  %v2411_v6 = vadd.f32 %v1329_v62, %v1326_v61  ;;  %v139_v8 = vld [vmem:[#allocation4 + $0x108] sm:$0xff]  ;;  %v1950_v9 = vpack.c.bf16 %v119_v2, %v118_v0  ;;  %v2417_v11 = vmul.f32 %v2406_v3, %v99_v4  ;;  %v168_v19 = vrot.slane %v2371_v22, 1  ;;  %v140_v21 = vld [vmem:[#allocation4 + $0x110] sm:$0xff]  ;;  %v141_v23 = vld [vmem:[#allocation4 + $0x118] sm:$0xff] }
  0x2f   :  { %v158_v55 = vrot.slane %v2386_v47, 7  ;;  %v1990_v16 = vpack.c.bf16 %v139_v8, %v138_v7  ;;  %v1954_v24 = vpack.c.bf16 %v121_v15, %v120_v14  ;;  %v456_v26 = vld [vmem:[#allocation4 + $0x180] sm:$0xff]  ;;  %v1994_v28 = vpack.c.bf16 %v141_v23, %v140_v21  ;;  %v2427_v29 = vld [vmem:[#allocation4 + $0x508] sm:$0xff]  ;;  %v459_v41 = vld [vmem:[#allocation4 + $0x198] sm:$0xff] }
  0x30   :  { %1937 = vmatpush3.bf16.msra.mxu1 %v1934_v31  ;;  %v156_v17 = vrot.slane %v2417_v11, 7  ;;  %v2421_v18 = vmul.f32 %v100_v10, %v2411_v6  ;;  %v169_v20 = vrot.slane %v2417_v11, 1  ;;  %v142_v31 = vld [vmem:[#allocation4 + $0x120] sm:$0xff]  ;;  %v143_v32 = vld [vmem:[#allocation4 + $0x128] sm:$0xff]  ;;  %v2449_v44 = vld [vmem:[#allocation4 + $0x518] sm:$0xff]  ;;  %v171_v14 = vrot.slane %v2386_v47, 1 }
  0x31   :  { %1973 = vmatpush3.bf16.msra.mxu0 %v1970_v27  ;;  %1939 = vmatprep.subr.bf16.mxu1 %v1938_v40  ;;  %v163_v57 = vsel %vm159_vm3, %v158_v55, %v155_v48  ;;  %v457_v27 = vld [vmem:[#allocation4 + $0x188] sm:$0xff]  ;;  %v2433_v33 = vld [vmem:[#allocation4 + $0x520] sm:$0xff]  ;;  %v1998_v42 = vpack.c.bf16 %v143_v32, %v142_v31  ;;  %v144_v46 = vld [vmem:[#allocation4 + $0x130] sm:$0xff] }
  0x32   :  { %1975 = vmatprep.subr.bf16.mxu0 %v1974_v36  ;;  %v164_v63 = vmul.f32 %v163_v57, %v2392_v54  ;;  %v157_v25 = vrot.slane %v2421_v18, 7  ;;  %v162_v30 = vsel %vm159_vm3, %v155_v48, %v156_v17  ;;  %v175_v34 = vsel %vm172_vm7, %v168_v19, %v169_v20  ;;  %v145_v48 = vld [vmem:[#allocation4 + $0x138] sm:$0xff]  ;;  %v460_v52 = vld [vmem:[#allocation4 + $0x1a0] sm:$0xff]  ;;  %v461_v53 = vld [vmem:[#allocation4 + $0x1a8] sm:$0xff] }
  0x33   :  { %v2022_v35 = vpack.c.bf16 %v457_v27, %v456_v26  ;;  %v165_v39 = vmul.f32 %v162_v30, %v2427_v29  ;;  %v177_v43 = vmul.f32 %v175_v34, %v2433_v33  ;;  %v146_v57 = vld [vmem:[#allocation4 + $0x140] sm:$0xff]  ;;  %v147_v58 = vld [vmem:[#allocation4 + $0x148] sm:$0xff]  ;;  %v462_v59 = vld [vmem:[#allocation4 + $0x1b0] sm:$0xff]  ;;  %v170_v10 = vrot.slane %v2421_v18, 1 }
  0x34   :  { %1941 = vmatpush3.bf16.msra.mxu1 %v1938_v40  ;;  %1570 = vmatprep.mubr.f32.mxu1 %v164_v63  ;;  %v161_v38 = vsel %vm159_vm3, %v156_v17, %v157_v25  ;;  %v458_v40 = vld [vmem:[#allocation4 + $0x190] sm:$0xff]  ;;  %v2006_v61 = vpack.c.bf16 %v147_v58, %v146_v57  ;;  %v149_v63 = vld [vmem:[#allocation4 + $0x158] sm:$0xff]  ;;  %v150_v4 = vld [vmem:[#allocation4 + $0x160] sm:$0xff] }
  0x35   :  { %1977 = vmatpush3.bf16.msra.mxu0 %v1974_v36  ;;  %1943 = vmatprep.subr.bf16.mxu1 %v1942_v51  ;;  %v2442_v36 = vld [vmem:[#allocation4 + $0x510] sm:$0xff]  ;;  %v2026_v50 = vpack.c.bf16 %v459_v41, %v458_v40  ;;  %v174_v17 = vsel %vm172_vm7, %v169_v20, %v170_v10  ;;  %v173_v23 = vsel %vm172_vm7, %v170_v10, %v171_v14  ;;  %v465_v26 = vld [vmem:[#allocation4 + $0x1c8] sm:$0xff]  ;;  %v467_v30 = vld [vmem:[#allocation4 + $0x1d8] sm:$0xff] }
  0x36   :  { %1979 = vmatprep.subr.bf16.mxu0 %v1978_v45  ;;  %v166_v49 = vmul.f32 %v161_v38, %v2442_v36  ;;  %v148_v62 = vld [vmem:[#allocation4 + $0x150] sm:$0xff]  ;;  %v468_v32 = vld [vmem:[#allocation4 + $0x1e0] sm:$0xff]  ;;  %v469_v22 = vld [vmem:[#allocation4 + $0x1e8] sm:$0xff] }
  0x37   :  { %v2010_v2 = vpack.c.bf16 %v149_v63, %v148_v62  ;;  %v152_v8 = vld [vmem:[#allocation4 + $0x170] sm:$0xff]  ;;  %v2046_v34 = vpack.c.bf16 %v469_v22, %v468_v32  ;;  %v473_v40 = vld [vmem:[#allocation4 + $0x208] sm:$0xff]  ;;  %v828_v1 = vld [vmem:[#allocation4 + $0x3c0] sm:$0xff] }
  0x38   :  { %1945 = vmatpush3.bf16.msra.mxu1 %v1942_v51  ;;  %v2466_v21 = vld [vmem:[#allocation4 + $0x530] sm:$0xff] }
  0x39   :  { %1981 = vmatpush3.bf16.msra.mxu0 %v1978_v45  ;;  %1947 = vmatprep.subr.bf16.mxu1 %v1946_v60  ;;  %v160_v45 = vsel %vm159_vm3, %v157_v25, %v158_v55  ;;  %v2030_v55 = vpack.c.bf16 %v461_v53, %v460_v52  ;;  %v464_v25 = vld [vmem:[#allocation4 + $0x1c0] sm:$0xff]  ;;  %v810_v53 = vld [vmem:[#allocation4 + $0x330] sm:$0xff] }
  0x3a   :  { %1983 = vmatprep.subr.bf16.mxu0 %v1982_v56  ;;  %v167_v51 = vmul.f32 %v160_v45, %v2449_v44  ;;  %v2038_v27 = vpack.c.bf16 %v465_v26, %v464_v25  ;;  %v806_v45 = vld [vmem:[#allocation4 + $0x310] sm:$0xff] }
  0x3c   :  { %1949 = vmatpush3.bf16.msra.mxu1 %v1946_v60  ;;  %v463_v60 = vld [vmem:[#allocation4 + $0x1b8] sm:$0xff] }
  0x3d   :  { %1985 = vmatpush3.bf16.msra.mxu0 %v1982_v56  ;;  %1951 = vmatprep.subr.bf16.mxu1 %v1950_v9  ;;  %v2002_v56 = vpack.c.bf16 %v145_v48, %v144_v46  ;;  %v2034_v0 = vpack.c.bf16 %v463_v60, %v462_v59  ;;  %v807_v48 = vld [vmem:[#allocation4 + $0x318] sm:$0xff] }
  0x3e   :  { %1987 = vmatprep.subr.bf16.mxu0 %v1986_v5 }
  0x40   :  { %1953 = vmatpush3.bf16.msra.mxu1 %v1950_v9  ;;  %v153_v9 = vld [vmem:[#allocation4 + $0x178] sm:$0xff] }
  0x41   :  { %1989 = vmatpush3.bf16.msra.mxu0 %v1986_v5  ;;  %1955 = vmatprep.subr.bf16.mxu1 %v1954_v24  ;;  %v151_v5 = vld [vmem:[#allocation4 + $0x168] sm:$0xff]  ;;  %v2018_v15 = vpack.c.bf16 %v153_v9, %v152_v8 }
  0x42   :  { %1991 = vmatprep.subr.bf16.mxu0 %v1990_v16  ;;  %v2014_v7 = vpack.c.bf16 %v151_v5, %v150_v4 }
  0x44   :  { %1609 = vmatmul.mubr.f32.vlgmr.msra.gmra.mrb[0].mxu0 %v2417_v11  ;;  %1957 = vmatpush3.bf16.msra.mxu1 %v1954_v24  ;;  %v2472_v24 = vld [vmem:[#allocation4 + $0x538] sm:$0xff]  ;;  %v176_v11 = vsel %vm172_vm7, %v171_v14, %v168_v19  ;;  %v470_v19 = vld [vmem:[#allocation4 + $0x1f0] sm:$0xff] }
  0x45   :  { %1993 = vmatpush3.bf16.msra.mxu0 %v1990_v16  ;;  %1611 = vmatprep.mubr.f32.mxu0 %v2421_v18  ;;  %v2460_v16 = vld [vmem:[#allocation4 + $0x528] sm:$0xff]  ;;  %v180_v20 = vmul.f32 %v176_v11, %v2472_v24 }
  0x46   :  { %1995 = vmatprep.subr.bf16.mxu0 %v1994_v28  ;;  %2023 = vmatprep.subr.bf16.mxu1 %v2022_v35  ;;  %v178_v18 = vmul.f32 %v174_v17, %v2460_v16 }
  0x47   :  { %1571 = vmatmul.mubr.f32.vlgmr.msra.gmra.mrb[0].mxu1 %v165_v39  ;;  %v472_v39 = vld [vmem:[#allocation4 + $0x200] sm:$0xff] }
  0x48   :  { %1612 = vmatmul.mubr.f32.gmra.mrb[2].mxu0 %v2386_v47  ;;  %1573 = vmatprep.mubr.f32.mxu1 %v166_v49  ;;  %v179_v47 = vmul.f32 %v173_v23, %v2466_v21  ;;  %v2479_v41 = vpack.c.bf16 %v473_v40, %v472_v39  ;;  %v2122_v49 = vpack.c.bf16 %v807_v48, %v806_v45  ;;  %v474_v39 = vld [vmem:[#allocation4 + $0x210] sm:$0xff]  ;;  %v475_v40 = vld [vmem:[#allocation4 + $0x218] sm:$0xff] }
  0x49   :  { %1997 = vmatpush3.bf16.msra.mxu0 %v1994_v28  ;;  %1646 = vmatprep.mubr.f32.mxu0 %v177_v43  ;;  %v466_v28 = vld [vmem:[#allocation4 + $0x1d0] sm:$0xff]  ;;  %v805_v43 = vld [vmem:[#allocation4 + $0x308] sm:$0xff] }
  0x4a   :  { %1999 = vmatprep.subr.bf16.mxu0 %v1998_v42  ;;  %2025 = vmatpush3.bf16.msra.mxu1 %v2022_v35  ;;  %v2042_v31 = vpack.c.bf16 %v467_v30, %v466_v28  ;;  %v471_v35 = vld [vmem:[#allocation4 + $0x1f8] sm:$0xff] }
  0x4b   :  { %2027 = vmatprep.subr.bf16.mxu1 %v2026_v50  ;;  %1574 = vmatmul.mubr.f32.gmra.mrb[2].mxu1 %v167_v51  ;;  %v2050_v38 = vpack.c.bf16 %v471_v35, %v470_v19  ;;  %v809_v51 = vld [vmem:[#allocation4 + $0x328] sm:$0xff] }
  0x4d   :  { %2001 = vmatpush3.bf16.msra.mxu0 %v1998_v42  ;;  %v804_v42 = vld [vmem:[#allocation4 + $0x300] sm:$0xff] }
  0x4e   :  { %2003 = vmatprep.subr.bf16.mxu0 %v2002_v56  ;;  %2029 = vmatpush3.bf16.msra.mxu1 %v2026_v50  ;;  %v2118_v46 = vpack.c.bf16 %v805_v43, %v804_v42  ;;  %v808_v50 = vld [vmem:[#allocation4 + $0x320] sm:$0xff] }
  0x4f   :  { %2031 = vmatprep.subr.bf16.mxu1 %v2030_v55  ;;  %v2126_v52 = vpack.c.bf16 %v809_v51, %v808_v50 }
  0x51   :  { %2005 = vmatpush3.bf16.msra.mxu0 %v2002_v56  ;;  %v811_v56 = vld [vmem:[#allocation4 + $0x338] sm:$0xff] }
  0x52   :  { %2007 = vmatprep.subr.bf16.mxu0 %v2006_v61  ;;  %2033 = vmatpush3.bf16.msra.mxu1 %v2030_v55  ;;  %v2130_v57 = vpack.c.bf16 %v811_v56, %v810_v53  ;;  %v476_v56 = vld [vmem:[#allocation4 + $0x220] sm:$0xff] }
  0x53   :  { %2035 = vmatprep.subr.bf16.mxu1 %v2034_v0 }
  0x55   :  { %2009 = vmatpush3.bf16.msra.mxu0 %v2006_v61  ;;  %v1331_v61 = vld [vmem:[#allocation4 + $0x548] ss:$0 sm:$0xff] }
  0x56   :  { %2011 = vmatprep.subr.bf16.mxu0 %v2010_v2  ;;  %2037 = vmatpush3.bf16.msra.mxu1 %v2034_v0 }
  0x57   :  { %2039 = vmatprep.subr.bf16.mxu1 %v2038_v27 }
  0x59   :  { %2013 = vmatpush3.bf16.msra.mxu0 %v2010_v2 }
  0x5a   :  { %2015 = vmatprep.subr.bf16.mxu0 %v2014_v7  ;;  %2041 = vmatpush3.bf16.msra.mxu1 %v2038_v27 }
  0x5b   :  { %2043 = vmatprep.subr.bf16.mxu1 %v2042_v31 }
  0x5d   :  { %2017 = vmatpush3.bf16.msra.mxu0 %v2014_v7 }
  0x5e   :  { %2019 = vmatprep.subr.bf16.mxu0 %v2018_v15  ;;  %2045 = vmatpush3.bf16.msra.mxu1 %v2042_v31 }
  0x5f   :  { %2047 = vmatprep.subr.bf16.mxu1 %v2046_v34 }
  0x61   :  { %2021 = vmatpush3.bf16.msra.mxu0 %v2018_v15 }
  0x62   :  { %2049 = vmatpush3.bf16.msra.mxu1 %v2046_v34  ;;  %2119 = vmatprep.subr.bf16.mxu0 %v2118_v46 }
  0x63   :  { %2051 = vmatprep.subr.bf16.mxu1 %v2050_v38 }
  0x64   :  { %1647 = vmatmul.mubr.f32.vlgmr.msra.gmra.mrb[0].mxu0 %v178_v18 }
  0x65   :  { %1649 = vmatprep.mubr.f32.mxu0 %v179_v47  ;;  %2121 = vmatpush3.bf16.msra.mxu0 %v2118_v46 }
  0x66   :  { %2053 = vmatpush3.bf16.msra.mxu1 %v2050_v38  ;;  %2123 = vmatprep.subr.bf16.mxu0 %v2122_v49 }
  0x67   :  { %2055 = vmatprep.subr.bf16.mxu1 %v2479_v41 }
  0x68   :  { %1650 = vmatmul.mubr.f32.gmra.mrb[2].mxu0 %v180_v20 }
  0x69   :  { %2125 = vmatpush3.bf16.msra.mxu0 %v2122_v49 }
  0x6a   :  { %2127 = vmatprep.subr.bf16.mxu0 %v2126_v52 }
  0x6d   :  { %2129 = vmatpush3.bf16.msra.mxu0 %v2126_v52  ;;  %v2058_v52 = vpack.c.bf16 %v475_v40, %v474_v39  ;;  %v499_v39 = vld [vmem:[#allocation4 + $0x2d8] sm:$0xff] }
  0x6e   :  { %2131 = vmatprep.subr.bf16.mxu0 %v2130_v57 }
  0x71   :  { %2133 = vmatpush3.bf16.msra.mxu0 %v2130_v57  ;;  %v477_v57 = vld [vmem:[#allocation4 + $0x228] sm:$0xff] }
 0x11a   :  { %v1572_v58 = vpop.f32.mrb[0].mxu1 }
 0x11b   :  { %v247_v55 = vpop.f32.mrb[1].mxu1 }
 0x11e   :  { %v1575_v59 = vpop.f32.mrb[2].mxu1 }
 0x11f   :  { %v257_v60 = vpop.f32.mrb[3].mxu1 }
 0x137   :  { %v1648_v62 = vpop.f32.mrb[0].mxu0 }
 0x138   :  { %v2244_v63 = vadd.f32 %v1648_v62, %v1572_v58  ;;  %v417_v0 = vpop.f32.mrb[1].mxu0  ;;  %v480_v62 = vld [vmem:[#allocation4 + $0x240] sm:$0xff] }
 0x139   :  { %v2245_v2 = vadd.f32 %v417_v0, %v247_v55  ;;  %v2062_v55 = vpack.c.bf16 %v477_v57, %v476_v56  ;;  %v812_v56 = vld [vmem:[#allocation4 + $0x340] sm:$0xff]  ;;  %v813_v57 = vld [vmem:[#allocation4 + $0x348] sm:$0xff] }
 0x13a   :  { %v445_v4 = vadd.f32 %v2244_v63, %v1331_v61  ;;  %v481_v63 = vld [vmem:[#allocation4 + $0x248] sm:$0xff] }
 0x13b   :  { %v444_v5 = vadd.f32 %v2245_v2, %v1331_v61  ;;  %v1651_v7 = vpop.f32.mrb[2].mxu0  ;;  %v2070_v0 = vpack.c.bf16 %v481_v63, %v480_v62  ;;  %v482_v2 = vld [vmem:[#allocation4 + $0x250] sm:$0xff]  ;;  %v819_v63 = vld [vmem:[#allocation4 + $0x378] sm:$0xff] }
 0x13c   :  { %v449_v8 = vmax.f32 %v445_v4, 0.0  ;;  %v2246_v9 = vadd.f32 %v1651_v7, %v1575_v59  ;;  %v427_v10 = vpop.f32.mrb[3].mxu0  ;;  %v478_v59 = vld [vmem:[#allocation4 + $0x230] sm:$0xff]  ;;  %v483_v4 = vld [vmem:[#allocation4 + $0x258] sm:$0xff]  ;;  %v485_v7 = vld [vmem:[#allocation4 + $0x268] sm:$0xff] }
 0x13d   :  { %v448_v14 = vmax.f32 %v444_v5, 0.0  ;;  %v2247_v15 = vadd.f32 %v427_v10, %v257_v60  ;;  %v479_v60 = vld [vmem:[#allocation4 + $0x238] sm:$0xff]  ;;  %v484_v5 = vld [vmem:[#allocation4 + $0x260] sm:$0xff] }
 0x13e   :  { %v2483_v17 = vmul.f32 %v2406_v3, %v449_v8  ;;  %v447_v23 = vadd.f32 %v2246_v9, %v1331_v61  ;;  %v2078_v8 = vpack.c.bf16 %v485_v7, %v484_v5  ;;  %v486_v9 = vld [vmem:[#allocation4 + $0x270] sm:$0xff]  ;;  %v487_v10 = vld [vmem:[#allocation4 + $0x278] sm:$0xff] }
 0x13f   :  { %v452_v18 = vmul.f32 %v2363_v13, %v448_v14  ;;  %v446_v47 = vadd.f32 %v2247_v15, %v1331_v61  ;;  %v2066_v61 = vpack.c.bf16 %v479_v60, %v478_v59  ;;  %v2082_v14 = vpack.c.bf16 %v487_v10, %v486_v9  ;;  %v488_v15 = vld [vmem:[#allocation4 + $0x280] sm:$0xff]  ;;  %v815_v59 = vld [vmem:[#allocation4 + $0x358] sm:$0xff] }
 0x140   :  { %v506_v11 = vrot.slane %v2483_v17, 7  ;;  %v451_v20 = vmax.f32 %v447_v23, 0.0  ;;  %v518_v25 = vrot.slane %v2483_v17, 1  ;;  %v489_v23 = vld [vmem:[#allocation4 + $0x288] sm:$0xff] }
 0x141   :  { %v450_v26 = vmax.f32 %v446_v47, 0.0  ;;  %v505_v27 = vrot.slane %v452_v18, 7  ;;  %v517_v28 = vrot.slane %v452_v18, 1  ;;  %v490_v47 = vld [vmem:[#allocation4 + $0x290] sm:$0xff] }
 0x142   :  { %v2489_v30 = vmul.f32 %v451_v20, %v2378_v37 }
 0x143   :  { %v2492_v31 = vmul.f32 %v450_v26, %v2411_v6  ;;  %v511_v32 = vsel %vm159_vm3, %v505_v27, %v506_v11  ;;  %v2498_v22 = vsel %vm172_vm7, %v517_v28, %v518_v25  ;;  %v493_v26 = vld [vmem:[#allocation4 + $0x2a8] sm:$0xff] }
 0x144   :  { %v508_v34 = vrot.slane %v2489_v30, 7  ;;  %v520_v19 = vrot.slane %v2489_v30, 1  ;;  %v514_v50 = vmul.f32 %v511_v32, %v2427_v29  ;;  %v494_v32 = vld [vmem:[#allocation4 + $0x2b0] sm:$0xff] }
 0x145   :  { %v519_v35 = vrot.slane %v2492_v31, 1  ;;  %v507_v38 = vrot.slane %v2492_v31, 7 }
 0x146   :  { %v512_v42 = vsel %vm159_vm3, %v508_v34, %v505_v27  ;;  %v2508_v43 = vsel %vm172_vm7, %v520_v19, %v517_v28  ;;  %v525_v28 = vmul.f32 %v2498_v22, %v2433_v33  ;;  %v501_v22 = vld [vmem:[#allocation4 + $0x2e8] sm:$0xff] }
 0x147   :  { %v513_v45 = vmul.f32 %v512_v42, %v2392_v54  ;;  %v510_v46 = vsel %vm159_vm3, %v506_v11, %v507_v38  ;;  %v509_v48 = vsel %vm159_vm3, %v507_v38, %v508_v34  ;;  %v2517_v49 = vsel %vm172_vm7, %v518_v25, %v519_v35  ;;  %v491_v11 = vld [vmem:[#allocation4 + $0x298] sm:$0xff]  ;;  %v492_v25 = vld [vmem:[#allocation4 + $0x2a0] sm:$0xff]  ;;  %v497_v38 = vld [vmem:[#allocation4 + $0x2c8] sm:$0xff] }
 0x148   :  { %v515_v51 = vmul.f32 %v510_v46, %v2442_v36  ;;  %v2523_v53 = vsel %vm172_vm7, %v519_v35, %v520_v19  ;;  %v516_v58 = vmul.f32 %v509_v48, %v2449_v44  ;;  %v2090_v20 = vpack.c.bf16 %v491_v11, %v490_v47  ;;  %v495_v34 = vld [vmem:[#allocation4 + $0x2b8] sm:$0xff]  ;;  %v496_v35 = vld [vmem:[#allocation4 + $0x2c0] sm:$0xff] }
 0x149   :  { %1684 = vmatprep.mubr.f32.mxu1 %v513_v45  ;;  %v2094_v27 = vpack.c.bf16 %v493_v26, %v492_v25  ;;  %v2098_v19 = vpack.c.bf16 %v495_v34, %v494_v32  ;;  %v500_v42 = vld [vmem:[#allocation4 + $0x2e0] sm:$0xff]  ;;  %v503_v46 = vld [vmem:[#allocation4 + $0x2f8] sm:$0xff] }
 0x14a   :  { %1685 = vmatmul.mubr.f32.vlgmr.msra.gmra.mrb[4].mxu1 %v514_v50  ;;  %v2110_v45 = vpack.c.bf16 %v501_v22, %v500_v42  ;;  %v526_v50 = vmul.f32 %v2517_v49, %v2460_v16  ;;  %v816_v49 = vld [vmem:[#allocation4 + $0x360] sm:$0xff]  ;;  %v822_v22 = vld [vmem:[#allocation4 + $0x390] sm:$0xff] }
 0x14b   :  { %2057 = vmatpush3.bf16.msra.mxu1 %v2479_v41  ;;  %1687 = vmatprep.mubr.f32.mxu1 %v515_v51  ;;  %v2074_v41 = vpack.c.bf16 %v483_v4, %v482_v2  ;;  %v527_v51 = vmul.f32 %v2523_v53, %v2466_v21  ;;  %v818_v53 = vld [vmem:[#allocation4 + $0x370] sm:$0xff]  ;;  %v821_v2 = vld [vmem:[#allocation4 + $0x388] sm:$0xff] }
 0x14c   :  { %2059 = vmatprep.subr.bf16.mxu1 %v2058_v52 }
 0x14e   :  { %1688 = vmatmul.mubr.f32.gmra.mrb[6].mxu1 %v516_v58  ;;  %v2134_v58 = vpack.c.bf16 %v813_v57, %v812_v56 }
 0x14f   :  { %2061 = vmatpush3.bf16.msra.mxu1 %v2058_v52  ;;  %1722 = vmatprep.mubr.f32.mxu1 %v452_v18  ;;  %v2086_v18 = vpack.c.bf16 %v489_v23, %v488_v15  ;;  %v528_v52 = vmul.f32 %v2508_v43, %v2472_v24  ;;  %v820_v43 = vld [vmem:[#allocation4 + $0x380] sm:$0xff] }
 0x150   :  { %2063 = vmatprep.subr.bf16.mxu1 %v2062_v55  ;;  %2135 = vmatprep.subr.bf16.mxu0 %v2134_v58  ;;  %v2150_v4 = vpack.c.bf16 %v821_v2, %v820_v43  ;;  %v832_v2 = vld [vmem:[#allocation4 + $0x3e0] sm:$0xff] }
 0x151   :  { %2137 = vmatpush3.bf16.msra.mxu0 %v2134_v58 }
 0x153   :  { %2065 = vmatpush3.bf16.msra.mxu1 %v2062_v55  ;;  %v814_v55 = vld [vmem:[#allocation4 + $0x350] sm:$0xff] }
 0x154   :  { %2067 = vmatprep.subr.bf16.mxu1 %v2066_v61  ;;  %v2138_v60 = vpack.c.bf16 %v815_v59, %v814_v55  ;;  %v824_v59 = vld [vmem:[#allocation4 + $0x3a0] sm:$0xff] }
 0x156   :  { %2139 = vmatprep.subr.bf16.mxu0 %v2138_v60 }
 0x157   :  { %2069 = vmatpush3.bf16.msra.mxu1 %v2066_v61  ;;  %2141 = vmatpush3.bf16.msra.mxu0 %v2138_v60  ;;  %v817_v61 = vld [vmem:[#allocation4 + $0x368] sm:$0xff] }
 0x158   :  { %2071 = vmatprep.subr.bf16.mxu1 %v2070_v0  ;;  %v2142_v62 = vpack.c.bf16 %v817_v61, %v816_v49  ;;  %v825_v60 = vld [vmem:[#allocation4 + $0x3a8] sm:$0xff]  ;;  %v826_v61 = vld [vmem:[#allocation4 + $0x3b0] sm:$0xff] }
 0x159   :  { %v2158_v49 = vpack.c.bf16 %v825_v60, %v824_v59 }
 0x15a   :  { %2143 = vmatprep.subr.bf16.mxu0 %v2142_v62 }
 0x15b   :  { %2073 = vmatpush3.bf16.msra.mxu1 %v2070_v0  ;;  %2145 = vmatpush3.bf16.msra.mxu0 %v2142_v62  ;;  %v2146_v0 = vpack.c.bf16 %v819_v63, %v818_v53  ;;  %v827_v62 = vld [vmem:[#allocation4 + $0x3b8] sm:$0xff]  ;;  %v830_v63 = vld [vmem:[#allocation4 + $0x3d0] sm:$0xff] }
 0x15c   :  { %2075 = vmatprep.subr.bf16.mxu1 %v2074_v41 }
 0x15d   :  { %2147 = vmatprep.subr.bf16.mxu0 %v2146_v0 }
 0x15f   :  { %2077 = vmatpush3.bf16.msra.mxu1 %v2074_v41  ;;  %2149 = vmatpush3.bf16.msra.mxu0 %v2146_v0  ;;  %v1332_v41 = vld [vmem:[#allocation4 + $0x550] ss:$0 sm:$0xff]  ;;  %v831_v0 = vld [vmem:[#allocation4 + $0x3d8] sm:$0xff] }
 0x160   :  { %2079 = vmatprep.subr.bf16.mxu1 %v2078_v8  ;;  %2151 = vmatprep.subr.bf16.mxu0 %v2150_v4  ;;  %v2170_v43 = vpack.c.bf16 %v831_v0, %v830_v63  ;;  %v1230_v0 = vld [vmem:[#allocation4 + $0x498] sm:$0xff] }
 0x163   :  { %2081 = vmatpush3.bf16.msra.mxu1 %v2078_v8 }
 0x164   :  { %2083 = vmatprep.subr.bf16.mxu1 %v2082_v14 }
 0x167   :  { %2085 = vmatpush3.bf16.msra.mxu1 %v2082_v14 }
 0x168   :  { %2087 = vmatprep.subr.bf16.mxu1 %v2086_v18 }
 0x16a   :  { %1723 = vmatmul.mubr.f32.vlgmr.msra.gmra.mrb[4].mxu1 %v2483_v17  ;;  %v2102_v17 = vpack.c.bf16 %v497_v38, %v496_v35 }
 0x16b   :  { %1725 = vmatprep.mubr.f32.mxu1 %v2492_v31  ;;  %2089 = vmatpush3.bf16.msra.mxu1 %v2086_v18  ;;  %v498_v31 = vld [vmem:[#allocation4 + $0x2d0] sm:$0xff] }
 0x16c   :  { %2091 = vmatprep.subr.bf16.mxu1 %v2090_v20  ;;  %v2106_v40 = vpack.c.bf16 %v499_v39, %v498_v31 }
 0x16e   :  { %1726 = vmatmul.mubr.f32.gmra.mrb[6].mxu1 %v2489_v30  ;;  %v502_v30 = vld [vmem:[#allocation4 + $0x2f0] sm:$0xff] }
 0x16f   :  { %2093 = vmatpush3.bf16.msra.mxu1 %v2090_v20  ;;  %1760 = vmatprep.mubr.f32.mxu1 %v525_v28  ;;  %v2114_v48 = vpack.c.bf16 %v503_v46, %v502_v30 }
 0x170   :  { %2095 = vmatprep.subr.bf16.mxu1 %v2094_v27 }
 0x173   :  { %2097 = vmatpush3.bf16.msra.mxu1 %v2094_v27 }
 0x174   :  { %2099 = vmatprep.subr.bf16.mxu1 %v2098_v19 }
 0x177   :  { %2101 = vmatpush3.bf16.msra.mxu1 %v2098_v19 }
 0x178   :  { %2103 = vmatprep.subr.bf16.mxu1 %v2102_v17 }
 0x17b   :  { %2105 = vmatpush3.bf16.msra.mxu1 %v2102_v17 }
 0x17c   :  { %2107 = vmatprep.subr.bf16.mxu1 %v2106_v40 }
 0x17f   :  { %2109 = vmatpush3.bf16.msra.mxu1 %v2106_v40 }
 0x180   :  { %2111 = vmatprep.subr.bf16.mxu1 %v2110_v45 }
 0x183   :  { %2113 = vmatpush3.bf16.msra.mxu1 %v2110_v45  ;;  %v823_v45 = vld [vmem:[#allocation4 + $0x398] sm:$0xff] }
 0x184   :  { %2115 = vmatprep.subr.bf16.mxu1 %v2114_v48  ;;  %v2154_v58 = vpack.c.bf16 %v823_v45, %v822_v22 }
 0x187   :  { %2117 = vmatpush3.bf16.msra.mxu1 %v2114_v48 }
 0x18a   :  { %1761 = vmatmul.mubr.f32.vlgmr.msra.gmra.mrb[4].mxu1 %v526_v50 }
 0x18b   :  { %1763 = vmatprep.mubr.f32.mxu1 %v527_v51 }
 0x18e   :  { %1764 = vmatmul.mubr.f32.gmra.mrb[6].mxu1 %v528_v52 }
 0x18f   :  { %1888 = vmatprep.mubr.msk.f32.mxu1 %vm2319_vm8, %v2317_v12 }
 0x25d   :  { %v1762_v5 = vpop.f32.mrb[4].mxu1 }
 0x25e   :  { %v793_v7 = vadd.f32 %v1762_v5, %v1332_v41  ;;  %v765_v8 = vpop.f32.mrb[5].mxu1  ;;  %v835_v5 = vld [vmem:[#allocation4 + $0x3f8] sm:$0xff] }
 0x25f   :  { %v792_v9 = vadd.f32 %v1332_v41, %v765_v8  ;;  %v836_v8 = vld [vmem:[#allocation4 + $0x400] sm:$0xff] }
 0x260   :  { %v797_v10 = vmax.f32 %v793_v7, 0.0 }
 0x261   :  { %v796_v14 = vmax.f32 %v792_v9, 0.0  ;;  %v1765_v15 = vpop.f32.mrb[6].mxu1  ;;  %v837_v9 = vld [vmem:[#allocation4 + $0x408] sm:$0xff] }
 0x262   :  { %v2539_v23 = vmul.f32 %v2406_v3, %v797_v10  ;;  %v795_v18 = vadd.f32 %v1765_v15, %v1332_v41  ;;  %v775_v47 = vpop.f32.mrb[7].mxu1  ;;  %v2182_v10 = vpack.c.bf16 %v837_v9, %v836_v8  ;;  %v839_v15 = vld [vmem:[#allocation4 + $0x418] sm:$0xff] }
 0x263   :  { %v800_v11 = vmul.f32 %v2363_v13, %v796_v14  ;;  %v794_v20 = vadd.f32 %v1332_v41, %v775_v47  ;;  %v834_v41 = vld [vmem:[#allocation4 + $0x3f0] sm:$0xff]  ;;  %v840_v47 = vld [vmem:[#allocation4 + $0x420] sm:$0xff]  ;;  %v1238_v9 = vld [vmem:[#allocation4 + $0x4d8] sm:$0xff] }
 0x264   :  { %v854_v25 = vrot.slane %v2539_v23, 7  ;;  %v866_v26 = vrot.slane %v2539_v23, 1  ;;  %v799_v27 = vmax.f32 %v795_v18, 0.0  ;;  %v2178_v7 = vpack.c.bf16 %v835_v5, %v834_v41  ;;  %v838_v14 = vld [vmem:[#allocation4 + $0x410] sm:$0xff]  ;;  %v1235_v5 = vld [vmem:[#allocation4 + $0x4c0] sm:$0xff] }
 0x265   :  { %v853_v28 = vrot.slane %v800_v11, 7  ;;  %v865_v32 = vrot.slane %v800_v11, 1  ;;  %v798_v34 = vmax.f32 %v794_v20, 0.0  ;;  %v2186_v18 = vpack.c.bf16 %v839_v15, %v838_v14  ;;  %v1239_v14 = vld [vmem:[#allocation4 + $0x4e0] sm:$0xff]  ;;  %v1240_v15 = vld [vmem:[#allocation4 + $0x4e8] sm:$0xff] }
 0x266   :  { %v2545_v19 = vmul.f32 %v799_v27, %v2378_v37  ;;  %v843_v27 = vld [vmem:[#allocation4 + $0x438] sm:$0xff] }
 0x267   :  { %v859_v35 = vsel %vm159_vm3, %v853_v28, %v854_v25  ;;  %v2550_v38 = vmul.f32 %v798_v34, %v2411_v6  ;;  %v2554_v17 = vsel %vm172_vm7, %v865_v32, %v866_v26  ;;  %v845_v34 = vld [vmem:[#allocation4 + $0x448] sm:$0xff] }
 0x268   :  { %v856_v31 = vrot.slane %v2545_v19, 7  ;;  %v868_v39 = vrot.slane %v2545_v19, 1  ;;  %v862_v56 = vmul.f32 %v859_v35, %v2427_v29  ;;  %v2162_v29 = vpack.c.bf16 %v827_v62, %v826_v61  ;;  %v846_v35 = vld [vmem:[#allocation4 + $0x450] sm:$0xff] }
 0x269   :  { %v855_v40 = vrot.slane %v2550_v38, 7  ;;  %v867_v42 = vrot.slane %v2550_v38, 1 }
 0x26a   :  { %v860_v30 = vsel %vm159_vm3, %v856_v31, %v853_v28  ;;  %v2564_v46 = vsel %vm172_vm7, %v868_v39, %v865_v32  ;;  %v844_v32 = vld [vmem:[#allocation4 + $0x440] sm:$0xff] }
 0x26b   :  { %v2568_v48 = vsel %vm172_vm7, %v866_v26, %v867_v42  ;;  %v861_v50 = vmul.f32 %v860_v30, %v2392_v54  ;;  %v858_v51 = vsel %vm159_vm3, %v854_v25, %v855_v40  ;;  %v857_v52 = vsel %vm159_vm3, %v855_v40, %v856_v31  ;;  %v842_v26 = vld [vmem:[#allocation4 + $0x430] sm:$0xff]  ;;  %v851_v40 = vld [vmem:[#allocation4 + $0x478] sm:$0xff] }
 0x26c   :  { %v863_v57 = vmul.f32 %v858_v51, %v2442_v36  ;;  %v2579_v55 = vsel %vm172_vm7, %v867_v42, %v868_v39  ;;  %v864_v54 = vmul.f32 %v857_v52, %v2449_v44  ;;  %v829_v36 = vld [vmem:[#allocation4 + $0x3c8] sm:$0xff]  ;;  %v873_v25 = vmul.f32 %v2554_v17, %v2433_v33  ;;  %v848_v39 = vld [vmem:[#allocation4 + $0x460] sm:$0xff]  ;;  %v1333_v51 = vld [vmem:[#allocation4 + $0x558] ss:$0 sm:$0xff] }
 0x26d   :  { %1798 = vmatprep.mubr.f32.mxu0 %v861_v50  ;;  %v2166_v53 = vpack.c.bf16 %v829_v36, %v828_v1  ;;  %v833_v44 = vld [vmem:[#allocation4 + $0x3e8] sm:$0xff]  ;;  %v2194_v28 = vpack.c.bf16 %v843_v27, %v842_v26  ;;  %v874_v22 = vmul.f32 %v2568_v48, %v2460_v16  ;;  %v875_v45 = vmul.f32 %v2579_v55, %v2466_v21  ;;  %v1227_v1 = vld [vmem:[#allocation4 + $0x480] sm:$0xff] }
 0x26e   :  { %1799 = vmatmul.mubr.f32.vlgmr.msra.gmra.mrb[4].mxu0 %v862_v56  ;;  %v849_v33 = vld [vmem:[#allocation4 + $0x468] sm:$0xff]  ;;  %v876_v30 = vmul.f32 %v2564_v46, %v2472_v24  ;;  %v2318_v50 = vmov 0.0|0.0   ;;  %v1335_v27 = vld [vmem:[#allocation4 + $0x560] ss:$0 sm:$0xff] }
 0x26f   :  { %2153 = vmatpush3.bf16.msra.mxu0 %v2150_v4  ;;  %1801 = vmatprep.mubr.f32.mxu0 %v863_v57  ;;  %v2174_v4 = vpack.c.bf16 %v833_v44, %v832_v2  ;;  %v2206_v17 = vpack.c.bf16 %v849_v33, %v848_v39  ;;  %v1228_v36 = vld [vmem:[#allocation4 + $0x488] sm:$0xff]  ;;  %v1233_v44 = vld [vmem:[#allocation4 + $0x4b0] sm:$0xff] }
 0x270   :  { %2155 = vmatprep.subr.bf16.mxu0 %v2154_v58  ;;  %2214 = vmatprep.subr.bf16.mxu1 %v2318_v50  ;;  %v2221_v63 = vpack.c.bf16 %v1228_v36, %v1227_v1 }
 0x272   :  { %1802 = vmatmul.mubr.f32.gmra.mrb[6].mxu0 %v864_v54 }
 0x273   :  { %2157 = vmatpush3.bf16.msra.mxu0 %v2154_v58  ;;  %1836 = vmatprep.mubr.f32.mxu0 %v800_v11  ;;  %v841_v11 = vld [vmem:[#allocation4 + $0x428] sm:$0xff] }
 0x274   :  { %2159 = vmatprep.subr.bf16.mxu0 %v2158_v49  ;;  %v2190_v20 = vpack.c.bf16 %v841_v11, %v840_v47  ;;  %v1241_v47 = vld [vmem:[#allocation4 + $0x4f0] sm:$0xff]  ;;  %v1242_v11 = vld [vmem:[#allocation4 + $0x4f8] sm:$0xff] }
 0x277   :  { %2161 = vmatpush3.bf16.msra.mxu0 %v2158_v49 }
 0x278   :  { %2163 = vmatprep.subr.bf16.mxu0 %v2162_v29 }
 0x27b   :  { %2165 = vmatpush3.bf16.msra.mxu0 %v2162_v29 }
 0x27c   :  { %2167 = vmatprep.subr.bf16.mxu0 %v2166_v53 }
 0x27f   :  { %2169 = vmatpush3.bf16.msra.mxu0 %v2166_v53 }
 0x280   :  { %2171 = vmatprep.subr.bf16.mxu0 %v2170_v43 }
 0x283   :  { %2173 = vmatpush3.bf16.msra.mxu0 %v2170_v43 }
 0x284   :  { %2175 = vmatprep.subr.bf16.mxu0 %v2174_v4 }
 0x287   :  { %2177 = vmatpush3.bf16.msra.mxu0 %v2174_v4  ;;  %v1234_v4 = vld [vmem:[#allocation4 + $0x4b8] sm:$0xff] }
 0x288   :  { %2179 = vmatprep.subr.bf16.mxu0 %v2178_v7  ;;  %v2230_v41 = vpack.c.bf16 %v1234_v4, %v1233_v44 }
 0x28b   :  { %2181 = vmatpush3.bf16.msra.mxu0 %v2178_v7  ;;  %v1236_v7 = vld [vmem:[#allocation4 + $0x4c8] sm:$0xff] }
 0x28c   :  { %2183 = vmatprep.subr.bf16.mxu0 %v2182_v10  ;;  %v2233_v8 = vpack.c.bf16 %v1236_v7, %v1235_v5 }
 0x28e   :  { %1837 = vmatmul.mubr.f32.vlgmr.msra.gmra.mrb[4].mxu0 %v2539_v23  ;;  %v2198_v23 = vpack.c.bf16 %v845_v34, %v844_v32 }
 0x28f   :  { %1839 = vmatprep.mubr.f32.mxu0 %v2550_v38  ;;  %2185 = vmatpush3.bf16.msra.mxu0 %v2182_v10  ;;  %v847_v38 = vld [vmem:[#allocation4 + $0x458] sm:$0xff] }
 0x290   :  { %2187 = vmatprep.subr.bf16.mxu0 %v2186_v18  ;;  %v2202_v31 = vpack.c.bf16 %v847_v38, %v846_v35 }
 0x292   :  { %1840 = vmatmul.mubr.f32.gmra.mrb[6].mxu0 %v2545_v19  ;;  %v850_v19 = vld [vmem:[#allocation4 + $0x470] sm:$0xff] }
 0x293   :  { %2189 = vmatpush3.bf16.msra.mxu0 %v2186_v18  ;;  %1874 = vmatprep.mubr.f32.mxu0 %v873_v25  ;;  %v2210_v42 = vpack.c.bf16 %v851_v40, %v850_v19  ;;  %v2239_v18 = vpack.c.bf16 %v1240_v15, %v1239_v14 }
 0x294   :  { %2191 = vmatprep.subr.bf16.mxu0 %v2190_v20 }
 0x297   :  { %2193 = vmatpush3.bf16.msra.mxu0 %v2190_v20  ;;  %v2242_v20 = vpack.c.bf16 %v1242_v11, %v1241_v47 }
 0x298   :  { %2195 = vmatprep.subr.bf16.mxu0 %v2194_v28 }
 0x29b   :  { %2197 = vmatpush3.bf16.msra.mxu0 %v2194_v28 }
 0x29c   :  { %2199 = vmatprep.subr.bf16.mxu0 %v2198_v23 }
 0x29f   :  { %2201 = vmatpush3.bf16.msra.mxu0 %v2198_v23 }
 0x2a0   :  { %2203 = vmatprep.subr.bf16.mxu0 %v2202_v31 }
 0x2a3   :  { %2205 = vmatpush3.bf16.msra.mxu0 %v2202_v31 }
 0x2a4   :  { %2207 = vmatprep.subr.bf16.mxu0 %v2206_v17 }
 0x2a7   :  { %2209 = vmatpush3.bf16.msra.mxu0 %v2206_v17 }
 0x2a8   :  { %2211 = vmatprep.subr.bf16.mxu0 %v2210_v42 }
 0x2ab   :  { %2213 = vmatpush3.bf16.msra.mxu0 %v2210_v42 }
 0x2ae   :  { %1875 = vmatmul.mubr.f32.vlgmr.msra.gmra.mrb[4].mxu0 %v874_v22 }
 0x2af   :  { %1877 = vmatprep.mubr.f32.mxu0 %v875_v45 }
 0x2b2   :  { %1878 = vmatmul.mubr.f32.gmra.mrb[6].mxu0 %v876_v30 }
 0x381   :  { %v1876_v52 = vpop.f32.mrb[4].mxu0 }
 0x382   :  { %v1141_v56 = vadd.f32 %v1876_v52, %v1333_v51  ;;  %v1113_v16 = vpop.f32.mrb[5].mxu0 }
 0x383   :  { %v1140_v48 = vadd.f32 %v1333_v51, %v1113_v16 }
 0x384   :  { %v1145_v57 = vmax.f32 %v1141_v56, 0.0 }
 0x385   :  { %v1144_v21 = vmax.f32 %v1140_v48, 0.0  ;;  %v1879_v58 = vpop.f32.mrb[6].mxu0 }
 0x386   :  { %v1149_v55 = vmul.f32 %v2406_v3, %v1145_v57  ;;  %v1143_v59 = vadd.f32 %v1879_v58, %v1333_v51  ;;  %v1123_v24 = vpop.f32.mrb[7].mxu0  ;;  %v1152_v3 = vld [vmem:[#allocation4 + $0x540] sm:$0xff] }
 0x387   :  { %v1148_v46 = vmul.f32 %v2363_v13, %v1144_v21  ;;  %v1142_v60 = vadd.f32 %v1333_v51, %v1123_v24  ;;  %v1229_v13 = vld [vmem:[#allocation4 + $0x490] sm:$0xff] }
 0x388   :  { %v1147_v54 = vmax.f32 %v1143_v59, 0.0  ;;  %v2224_v43 = vpack.c.bf16 %v1230_v0, %v1229_v13 }
 0x389   :  { %v2215_v49 = vpack.c.bf16 %v1149_v55, %v1148_v46  ;;  %v1146_v61 = vmax.f32 %v1142_v60, 0.0 }
 0x38a   :  { %v1151_v62 = vmul.f32 %v1147_v54, %v2378_v37  ;;  %v1231_v37 = vld [vmem:[#allocation4 + $0x4a0] sm:$0xff] }
 0x38b   :  { %v1150_v29 = vmul.f32 %v1146_v61, %v2411_v6  ;;  %2216 = vmatpush3.bf16.msra.mxu1 %v2215_v49  ;;  %v1232_v6 = vld [vmem:[#allocation4 + $0x4a8] sm:$0xff] }
 0x38c   :  { %2217 = vmatprep.subr.bf16.mxu1 %v2318_v50  ;;  %v2227_v2 = vpack.c.bf16 %v1232_v6, %v1231_v37 }
 0x38d   :  { %v2218_v53 = vpack.c.bf16 %v1151_v62, %v1150_v29 }
 0x38f   :  { %2219 = vmatpush3.bf16.msra.mxu1 %v2218_v53 }
 0x390   :  { %2220 = vmatprep.subr.bf16.mxu1 %v2318_v50 }
 0x392   :  { %1889 = vmatmul.mubr.msk.f32.vlgmr.msra.gmra.mrb[8].mxu1 %vm1153_vm9, %v1152_v3 }
 0x393   :  { %2222 = vmatpush3.bf16.msra.mxu1 %v2221_v63  ;;  %1923 = vmatprep.mubr.msk.f32.mxu1 %vm2319_vm8, %v2317_v12  ;;  %v1237_v12 = vld [vmem:[#allocation4 + $0x4d0] sm:$0xff] }
 0x394   :  { %2223 = vmatprep.subr.bf16.mxu1 %v2318_v50  ;;  %v2236_v10 = vpack.c.bf16 %v1238_v9, %v1237_v12 }
 0x397   :  { %2225 = vmatpush3.bf16.msra.mxu1 %v2224_v43 }
 0x398   :  { %2226 = vmatprep.subr.bf16.mxu1 %v2318_v50 }
 0x39b   :  { %2228 = vmatpush3.bf16.msra.mxu1 %v2227_v2 }
 0x39c   :  { %2229 = vmatprep.subr.bf16.mxu1 %v2318_v50 }
 0x39f   :  { %2231 = vmatpush3.bf16.msra.mxu1 %v2230_v41 }
 0x3a0   :  { %2232 = vmatprep.subr.bf16.mxu1 %v2318_v50 }
 0x3a3   :  { %2234 = vmatpush3.bf16.msra.mxu1 %v2233_v8 }
 0x3a4   :  { %2235 = vmatprep.subr.bf16.mxu1 %v2318_v50 }
 0x3a7   :  { %2237 = vmatpush3.bf16.msra.mxu1 %v2236_v10 }
 0x3a8   :  { %2238 = vmatprep.subr.bf16.mxu1 %v2318_v50 }
 0x3ab   :  { %2240 = vmatpush3.bf16.msra.mxu1 %v2239_v18 }
 0x3ac   :  { %2241 = vmatprep.subr.bf16.mxu1 %v2318_v50 }
 0x3af   :  { %2243 = vmatpush3.bf16.msra.mxu1 %v2242_v20 }
 0x465   :  { %v1223_v25 = vpop.f32.mrb[8].mxu1 }
 0x466   :  { %v1890_v26 = vpop.f32.mrb[9].mxu1  ;;  %1924 = vmatmul.mubr.f32.vlgmr.msra.gmra.mrb[10].mxu1 %v1223_v25 }
 0x539   :  { %v1314_v28 = vpop.f32.mrb[10].mxu1 }
 0x53a   :  { %v1315_v32 = vadd.f32 %v1335_v27, %v1314_v28  ;;  %v1925_v34 = vpop.f32.mrb[11].mxu1 }
 0x53c   :  { %1318 = vst [vmem:[%s2617_s3] sm:$0xff] %v1315_v32 }
 0x53d   :  { %1323 = vsyncpa [#allocation5], 1 }

</bundles_post_ra>
